<compile_context>
chip_gen: v7x
topology: tpu7x:2x2x1
jax: 0.10.0
libtpu: 0.0.40
codegen_flags: <defaults>
</compile_context>

<pallas_src>
from functools import partial

import numpy as np
import jax
import jax.numpy as jnp
from jax.experimental import pallas as pl
from jax.experimental.pallas import tpu as pltpu


def _round_up(x, m):
    return ((x + m - 1) // m) * m


def _supcon_kernel(a_ref, c_ref, alab_ref, clab_ref, out_ref,
                   m_sc, l_sc, spl_sc, sp_sc,
                   *, inv_temp, loss_scale, n_contrast, diag_stride):
    """Row-tile (grid axis 0, parallel) x contrast-tile (grid axis 1, reduction).

    Per anchor row r:
      lse_r  = log sum_{valid j, j != diag(r)} exp(q_r . k_j / T)
      mlpp_r = (sum_j pos_rj*logit_rj - lse_r*sum_j pos_rj) / sum_j pos_rj
      loss_r = -(T / T_base) * mlpp_r
    The mean over rows is finished in the wrapper.  The softmax stabilizer is
    a running max over *kept* columns; since the stabilizer cancels exactly in
    log_prob, this matches the PyTorch reference to f32 accuracy while keeping
    every exp argument <= 0.
    """
    tm = a_ref.shape[0]
    tn = c_ref.shape[0]
    j = pl.program_id(1)

    @pl.when(j == 0)
    def _init():
        m_sc[...] = jnp.full_like(m_sc, -jnp.inf)
        l_sc[...] = jnp.zeros_like(l_sc)
        spl_sc[...] = jnp.zeros_like(spl_sc)
        sp_sc[...] = jnp.zeros_like(sp_sc)

    # Fold 1/temperature into the small [tm, D] anchor tile (D << tn in practice).
    a = a_ref[...] * inv_temp                        # [tm, D]
    c = c_ref[...]                                   # [tn, D]
    # Contract directly over D — no explicit transpose of the contrast tile.
    logits = jax.lax.dot_general(
        a, c, dimension_numbers=(((1,), (1,)), ((), ())),
        preferred_element_type=jnp.float32)          # [tm, tn] raw logits

    # Rebuild masks in-kernel (no dense [Na, Nc] HBM masks).  Index math stays
    # in [tm,1] / [1,tn] shapes; only the compares broadcast to [tm, tn].
    row_ids = pl.program_id(0) * tm + jax.lax.broadcasted_iota(jnp.int32, (tm, 1), 0)
    col_ids = j * tn + jax.lax.broadcasted_iota(jnp.int32, (1, tn), 1)
    col_valid = col_ids < n_contrast                 # [1, tn]  drop padded columns
    not_self = col_ids != row_ids * diag_stride      # [tm, tn] self-contrast exclusion
    same_label = alab_ref[...] == clab_ref[...]      # [tm,1] == [1,tn] -> [tm,tn]

    keep = jnp.logical_and(not_self, col_valid)      # [tm, tn]
    pos = jnp.logical_and(same_label, keep)          # [tm, tn]

    # Single masked-logits tensor feeds both the max and the exp.
    neg_inf = jnp.float32(-jnp.inf)
    masked_logits = jnp.where(keep, logits, neg_inf)

    # Online softmax over the contrast axis.
    m_old = m_sc[...]
    m_new = jnp.maximum(m_old, jnp.max(masked_logits, axis=1, keepdims=True))
    p = jnp.exp(masked_logits - m_new)               # excluded cols -> exp(-inf) = 0
    l_sc[...] = l_sc[...] * jnp.exp(m_old - m_new) + jnp.sum(p, axis=1, keepdims=True)
    # Fused positive reductions: log_prob is never materialized.
    spl_sc[...] += jnp.sum(jnp.where(pos, logits, 0.0), axis=1, keepdims=True)
    sp_sc[...] += jnp.sum(jnp.where(pos, 1.0, 0.0), axis=1, keepdims=True)
    m_sc[...] = m_new

    @pl.when(j == pl.num_programs(1) - 1)
    def _finalize():
        lse = m_sc[...] + jnp.log(l_sc[...])
        sp = sp_sc[...]
        # Exact divide: a [tm, 1] vector once per row tile (off the [tm, tn]
        # hot path), so it costs nothing and keeps 1e-5 fidelity.  Rows with
        # zero positives give NaN, matching the PyTorch reference; padded rows
        # are sliced off by the wrapper before the mean.
        mlpp = (spl_sc[...] - lse * sp) / sp
        out_ref[...] = (-loss_scale) * mlpp


def supcon_loss(features, labels=None, mask=None, *, temperature=0.07,
                contrast_mode='all', base_temperature=0.07,
                block_rows=256, block_cols=1024):
    if features.ndim < 3:
        raise ValueError('`features` needs to be [bsz, n_views, ...], '
                         'at least 3 dimensions are required')
    bsz, n_views = features.shape[0], features.shape[1]
    feat = features.reshape(bsz, n_views, -1).astype(jnp.float32)
    D = feat.shape[-1]

    if labels is not None and mask is not None:
        raise ValueError('Cannot define both `labels` and `mask`')
    if mask is not None:
        # TODO(synk): arbitrary dense [bsz, bsz] `mask` needs a per-tile gather;
        # only the `labels` / SimCLR (labels=None) paths are ported to the kernel.
        raise NotImplementedError('explicit `mask` is not supported by the Pallas kernel')
    if labels is None:
        labels_eff = jnp.arange(bsz, dtype=jnp.int32)    # SimCLR: each sample its own class
    else:
        labels_eff = jnp.reshape(labels, (-1,)).astype(jnp.int32)
        if labels_eff.shape[0] != bsz:
            raise ValueError('Num of labels does not match num of features')

    # Sample-major flattening (free reshape — avoids the HBM copy a view-major
    # transpose+reshape would make).  The in-kernel mask indices match this
    # ordering; the final mean over anchors is order-invariant.
    contrast_feat = feat.reshape(bsz * n_views, D)
    contrast_lab = jnp.repeat(labels_eff, n_views)
    if contrast_mode == 'one':
        anchor_feat = feat[:, 0]
        anchor_lab = labels_eff
        diag_stride = n_views     # anchor row r excludes contrast col r*n_views (= sample r, view 0)
    elif contrast_mode == 'all':
        anchor_feat = contrast_feat
        anchor_lab = contrast_lab
        diag_stride = 1           # anchor row r excludes contrast col r (same sample & view)
    else:
        raise ValueError('Unknown mode: {}'.format(contrast_mode))

    na = anchor_feat.shape[0]
    nc = contrast_feat.shape[0]

    # Row tile multiple of 8 (sublane), contrast tile multiple of 128 (lane), so
    # all BlockSpecs obey the (8,128) rule; defaults sized to fit the default
    # scoped VMEM on v5e/v6e/v7x with double-buffered feature tiles.
    tm = min(block_rows, _round_up(na, 8))
    tn = min(block_cols, _round_up(nc, 128))
    na_pad = _round_up(na, tm)
    nc_pad = _round_up(nc, tn)

    def pad_rows(x, n, fill):
        if x.shape[0] == n:
            return x
        widths = ((0, n - x.shape[0]),) + ((0, 0),) * (x.ndim - 1)
        return jnp.pad(x, widths, constant_values=fill)

    a_f = pad_rows(anchor_feat, na_pad, 0.0)
    c_f = pad_rows(contrast_feat, nc_pad, 0.0)
    a_l = pad_rows(anchor_lab, na_pad, -1).reshape(na_pad, 1)   # pad labels never match
    c_l = pad_rows(contrast_lab, nc_pad, -2).reshape(1, nc_pad)

    kernel = partial(_supcon_kernel,
                     inv_temp=float(1.0 / temperature),
                     loss_scale=float(temperature / base_temperature),
                     n_contrast=int(nc),
                     diag_stride=int(diag_stride))

    per_row = pl.pallas_call(
        kernel,
        out_shape=jax.ShapeDtypeStruct((na_pad, 1), jnp.float32),
        grid=(na_pad // tm, nc_pad // tn),
        in_specs=[
            pl.BlockSpec((tm, D), lambda i, j: (i, 0)),   # anchor feature tile
            pl.BlockSpec((tn, D), lambda i, j: (j, 0)),   # contrast feature tile
            pl.BlockSpec((tm, 1), lambda i, j: (i, 0)),   # anchor labels (column)
            pl.BlockSpec((1, tn), lambda i, j: (0, j)),   # contrast labels (row)
        ],
        out_specs=pl.BlockSpec((tm, 1), lambda i, j: (i, 0)),
        scratch_shapes=[pltpu.VMEM((tm, 1), jnp.float32)] * 4,  # m, l, sum(pos*logit), count(pos)
        compiler_params=pltpu.CompilerParams(
            dimension_semantics=("parallel", "arbitrary")),
    )(a_f, c_f, a_l, c_l)

    # Drop padded rows; mean over all anchors == loss.view(anchor_count, bsz).mean().
    return jnp.mean(per_row[:na, 0])


def _reference(features, labels=None, *, temperature=0.07, contrast_mode='all',
               base_temperature=0.07):
    """Pure-JAX mirror of the PyTorch forward (view-major concat, dense masks)."""
    bsz, n_views = features.shape[0], features.shape[1]
    feat = features.reshape(bsz, n_views, -1).astype(jnp.float32)
    D = feat.shape[-1]
    if labels is None:
        base_mask = jnp.eye(bsz, dtype=jnp.float32)
    else:
        l = jnp.reshape(labels, (-1, 1))
        base_mask = (l == l.T).astype(jnp.float32)
    contrast_feature = jnp.transpose(feat, (1, 0, 2)).reshape(n_views * bsz, D)
    if contrast_mode == 'one':
        anchor_feature = feat[:, 0]
        anchor_count = 1
    else:
        anchor_feature = contrast_feature
        anchor_count = n_views
    na = anchor_count * bsz
    nc = n_views * bsz
    adc = jnp.matmul(anchor_feature, contrast_feature.T) / temperature
    logits = adc - jnp.max(adc, axis=1, keepdims=True)
    mask_rep = jnp.tile(base_mask, (anchor_count, n_views))
    logits_mask = 1.0 - jnp.eye(na, nc, dtype=jnp.float32)
    mask_rep = mask_rep * logits_mask
    exp_logits = jnp.exp(logits) * logits_mask
    log_prob = logits - jnp.log(jnp.sum(exp_logits, axis=1, keepdims=True))
    mlpp = jnp.sum(mask_rep * log_prob, axis=1) / jnp.sum(mask_rep, axis=1)
    loss = -(temperature / base_temperature) * mlpp
    return jnp.mean(loss)


if __name__ == "__main__":
    key = jax.random.PRNGKey(0)
    k1, k2 = jax.random.split(key)
    bsz, n_views, D = 8, 2, 32
    feats = jax.random.normal(k1, (bsz, n_views, D), dtype=jnp.float32)
    feats = feats / jnp.linalg.norm(feats, axis=-1, keepdims=True)  # typical SupCon input
    labels = jax.random.randint(k2, (bsz,), 0, 4)

    loss_sup = jax.block_until_ready(supcon_loss(feats, labels=labels))
    loss_simclr = jax.block_until_ready(supcon_loss(feats))
    loss_one = jax.block_until_ready(supcon_loss(feats, labels=labels, contrast_mode='one'))

    np.testing.assert_allclose(np.asarray(loss_sup),
                               np.asarray(_reference(feats, labels)),
                               rtol=1e-4, atol=1e-5)
    np.testing.assert_allclose(np.asarray(loss_simclr),
                               np.asarray(_reference(feats, None)),
                               rtol=1e-4, atol=1e-5)
    np.testing.assert_allclose(np.asarray(loss_one),
                               np.asarray(_reference(feats, labels, contrast_mode='one')),
                               rtol=1e-4, atol=1e-5)
    print("KERNEL_OK")
</pallas_src>

<mosaic_0001>
module attributes {stable_mosaic.version = 11 : i64} {
  func.func @_supcon_kernel(%arg0: i32, %arg1: i32, %arg2: memref<16x32xf32, #tpu.memory_space<vmem>>, %arg3: memref<128x32xf32, #tpu.memory_space<vmem>>, %arg4: memref<16x1xi32, #tpu.memory_space<vmem>>, %arg5: memref<1x128xi32, #tpu.memory_space<vmem>>, %arg6: memref<16x1xf32, #tpu.memory_space<vmem>>, %arg7: memref<16x1xf32, #tpu.memory_space<vmem>>, %arg8: memref<16x1xf32, #tpu.memory_space<vmem>>, %arg9: memref<16x1xf32, #tpu.memory_space<vmem>>, %arg10: memref<16x1xf32, #tpu.memory_space<vmem>>) attributes {dimension_semantics = [#tpu.dimension_semantics<parallel>, #tpu.dimension_semantics<arbitrary>], iteration_bounds = array<i64: 1, 1>, scalar_prefetch = 0 : i64, scratch_operands = 4 : i64, tpu.core_type = #tpu.core_type<tc>, window_params = [{transform_indices = @transform_0, window_bounds = array<i64: 16, 32>}, {transform_indices = @transform_1, window_bounds = array<i64: 128, 32>}, {transform_indices = @transform_2, window_bounds = array<i64: 16, 1>}, {transform_indices = @transform_3, window_bounds = array<i64: 1, 128>}, {transform_indices = @transform_4, window_bounds = array<i64: 16, 1>}]} {
    %c0_i32 = arith.constant 0 : i32
    %0 = arith.cmpi eq, %arg1, %c0_i32 : i32
    %1 = arith.extui %0 : i1 to i32
    %c0_i32_0 = arith.constant 0 : i32
    %2 = arith.cmpi ne, %1, %c0_i32_0 : i32
    scf.if %2 {
      %cst_36 = arith.constant 0xFF800000 : f32
      %67 = vector.broadcast %cst_36 : f32 to vector<16x1xf32>
      %c0_37 = arith.constant 0 : index
      %c0_38 = arith.constant 0 : index
      %68 = vector.load %arg7[%c0_37, %c0_38] : memref<16x1xf32, #tpu.memory_space<vmem>>, vector<16x1xf32>
      tpu.vector_store %arg7[%c0_37, %c0_38], %67 {strides = array<i32>} : memref<16x1xf32, #tpu.memory_space<vmem>>, vector<16x1xf32>,
      %cst_39 = arith.constant 0.000000e+00 : f32
      %69 = vector.broadcast %cst_39 : f32 to vector<16x1xf32>
      %c0_40 = arith.constant 0 : index
      %c0_41 = arith.constant 0 : index
      %70 = vector.load %arg8[%c0_40, %c0_41] : memref<16x1xf32, #tpu.memory_space<vmem>>, vector<16x1xf32>
      tpu.vector_store %arg8[%c0_40, %c0_41], %69 {strides = array<i32>} : memref<16x1xf32, #tpu.memory_space<vmem>>, vector<16x1xf32>,
      %cst_42 = arith.constant 0.000000e+00 : f32
      %71 = vector.broadcast %cst_42 : f32 to vector<16x1xf32>
      %c0_43 = arith.constant 0 : index
      %c0_44 = arith.constant 0 : index
      %72 = vector.load %arg9[%c0_43, %c0_44] : memref<16x1xf32, #tpu.memory_space<vmem>>, vector<16x1xf32>
      tpu.vector_store %arg9[%c0_43, %c0_44], %71 {strides = array<i32>} : memref<16x1xf32, #tpu.memory_space<vmem>>, vector<16x1xf32>,
      %cst_45 = arith.constant 0.000000e+00 : f32
      %73 = vector.broadcast %cst_45 : f32 to vector<16x1xf32>
      %c0_46 = arith.constant 0 : index
      %c0_47 = arith.constant 0 : index
      %74 = vector.load %arg10[%c0_46, %c0_47] : memref<16x1xf32, #tpu.memory_space<vmem>>, vector<16x1xf32>
      tpu.vector_store %arg10[%c0_46, %c0_47], %73 {strides = array<i32>} : memref<16x1xf32, #tpu.memory_space<vmem>>, vector<16x1xf32>,
    } else {
    }
    %c0 = arith.constant 0 : index
    %c0_1 = arith.constant 0 : index
    %3 = vector.load %arg2[%c0, %c0_1] : memref<16x32xf32, #tpu.memory_space<vmem>>, vector<16x32xf32>
    %cst = arith.constant 14.2857141 : f32
    %4 = vector.broadcast %cst : f32 to vector<16x32xf32>
    %5 = arith.mulf %3, %4 : vector<16x32xf32>
    %c0_2 = arith.constant 0 : index
    %c0_3 = arith.constant 0 : index
    %6 = vector.load %arg3[%c0_2, %c0_3] : memref<128x32xf32, #tpu.memory_space<vmem>>, vector<128x32xf32>
    %cst_4 = arith.constant dense<0.000000e+00> : vector<16x128xf32>
    %7 = tpu.matmul %5, %6, %cst_4 {dimension_numbers = #tpu.dot_dimension_numbers<[1], [1], [0], [0], [0, 0, 1, 0], [], []>} : vector<16x32xf32>, vector<128x32xf32>, vector<16x128xf32> -> vector<16x128xf32>
    %c16_i32 = arith.constant 16 : i32
    %8 = arith.muli %arg0, %c16_i32 : i32
    %9 = tpu.iota {dimensions = array<i32: 0>} : vector<16x1xi32>
    %10 = vector.broadcast %8 : i32 to vector<16x1xi32>
    %11 = arith.addi %10, %9 : vector<16x1xi32>
    %c128_i32 = arith.constant 128 : i32
    %12 = arith.muli %arg1, %c128_i32 : i32
    %13 = tpu.iota {dimensions = array<i32: 1>} : vector<1x128xi32>
    %14 = vector.broadcast %12 : i32 to vector<1x128xi32>
    %15 = arith.addi %14, %13 : vector<1x128xi32>
    %c16_i32_5 = arith.constant 16 : i32
    %16 = vector.broadcast %c16_i32_5 : i32 to vector<1x128xi32>
    %17 = arith.cmpi slt, %15, %16 : vector<1x128xi32>
    %c1_i32 = arith.constant 1 : i32
    %18 = vector.broadcast %c1_i32 : i32 to vector<16x1xi32>
    %19 = arith.muli %11, %18 : vector<16x1xi32>
    %20 = vector.broadcast %15 : vector<1x128xi32> to vector<16x128xi32>
    %21 = vector.broadcast %19 : vector<16x1xi32> to vector<16x128xi32>
    %22 = arith.cmpi ne, %20, %21 : vector<16x128xi32>
    %c0_6 = arith.constant 0 : index
    %c0_7 = arith.constant 0 : index
    %23 = vector.load %arg4[%c0_6, %c0_7] : memref<16x1xi32, #tpu.memory_space<vmem>>, vector<16x1xi32>
    %c0_8 = arith.constant 0 : index
    %c0_9 = arith.constant 0 : index
    %24 = vector.load %arg5[%c0_8, %c0_9] : memref<1x128xi32, #tpu.memory_space<vmem>>, vector<1x128xi32>
    %25 = vector.broadcast %23 : vector<16x1xi32> to vector<16x128xi32>
    %26 = vector.broadcast %24 : vector<1x128xi32> to vector<16x128xi32>
    %27 = arith.cmpi eq, %25, %26 : vector<16x128xi32>
    %28 = vector.broadcast %17 : vector<1x128xi1> to vector<16x128xi1>
    %29 = arith.andi %22, %28 : vector<16x128xi1>
    %30 = arith.andi %27, %29 : vector<16x128xi1>
    %cst_10 = arith.constant 0xFF800000 : f32
    %31 = vector.broadcast %cst_10 : f32 to vector<16x128xf32>
    %32 = arith.select %29, %7, %31 : vector<16x128xi1>, vector<16x128xf32>
    %c0_11 = arith.constant 0 : index
    %c0_12 = arith.constant 0 : index
    %33 = vector.load %arg7[%c0_11, %c0_12] : memref<16x1xf32, #tpu.memory_space<vmem>>, vector<16x1xf32>
    %cst_13 = arith.constant dense<0xFF800000> : vector<16xf32>
    %34 = vector.multi_reduction <maximumf>, %32, %cst_13 [1] : vector<16x128xf32> to vector<16xf32>
    %35 = vector.shape_cast %34 : vector<16xf32> to vector<16x1xf32>
    %36 = arith.maximumf %33, %35 : vector<16x1xf32>
    %37 = vector.broadcast %36 : vector<16x1xf32> to vector<16x128xf32>
    %38 = arith.subf %32, %37 : vector<16x128xf32>
    %39 = math.exp %38 : vector<16x128xf32>
    %c0_14 = arith.constant 0 : index
    %c0_15 = arith.constant 0 : index
    %40 = vector.load %arg8[%c0_14, %c0_15] : memref<16x1xf32, #tpu.memory_space<vmem>>, vector<16x1xf32>
    %41 = arith.subf %33, %36 : vector<16x1xf32>
    %42 = math.exp %41 : vector<16x1xf32>
    %43 = arith.mulf %40, %42 : vector<16x1xf32>
    %cst_16 = arith.constant dense<0.000000e+00> : vector<16xf32>
    %44 = vector.multi_reduction <add>, %39, %cst_16 [1] : vector<16x128xf32> to vector<16xf32>
    %45 = vector.shape_cast %44 : vector<16xf32> to vector<16x1xf32>
    %46 = arith.addf %43, %45 : vector<16x1xf32>
    %c0_17 = arith.constant 0 : index
    %c0_18 = arith.constant 0 : index
    %47 = vector.load %arg8[%c0_17, %c0_18] : memref<16x1xf32, #tpu.memory_space<vmem>>, vector<16x1xf32>
    tpu.vector_store %arg8[%c0_17, %c0_18], %46 {strides = array<i32>} : memref<16x1xf32, #tpu.memory_space<vmem>>, vector<16x1xf32>,
    %c0_19 = arith.constant 0 : index
    %c0_20 = arith.constant 0 : index
    %48 = vector.load %arg9[%c0_19, %c0_20] : memref<16x1xf32, #tpu.memory_space<vmem>>, vector<16x1xf32>
    %cst_21 = arith.constant 0.000000e+00 : f32
    %49 = vector.broadcast %cst_21 : f32 to vector<16x128xf32>
    %50 = arith.select %30, %7, %49 : vector<16x128xi1>, vector<16x128xf32>
    %cst_22 = arith.constant dense<0.000000e+00> : vector<16xf32>
    %51 = vector.multi_reduction <add>, %50, %cst_22 [1] : vector<16x128xf32> to vector<16xf32>
    %52 = vector.shape_cast %51 : vector<16xf32> to vector<16x1xf32>
    %53 = arith.addf %48, %52 : vector<16x1xf32>
    %c0_23 = arith.constant 0 : index
    %c0_24 = arith.constant 0 : index
    %54 = vector.load %arg9[%c0_23, %c0_24] : memref<16x1xf32, #tpu.memory_space<vmem>>, vector<16x1xf32>
    tpu.vector_store %arg9[%c0_23, %c0_24], %53 {strides = array<i32>} : memref<16x1xf32, #tpu.memory_space<vmem>>, vector<16x1xf32>,
    %c0_25 = arith.constant 0 : index
    %c0_26 = arith.constant 0 : index
    %55 = vector.load %arg10[%c0_25, %c0_26] : memref<16x1xf32, #tpu.memory_space<vmem>>, vector<16x1xf32>
    %cst_27 = arith.constant 1.000000e+00 : f32
    %cst_28 = arith.constant 0.000000e+00 : f32
    %56 = vector.broadcast %cst_27 : f32 to vector<16x128xf32>
    %57 = vector.broadcast %cst_28 : f32 to vector<16x128xf32>
    %58 = arith.select %30, %56, %57 : vector<16x128xi1>, vector<16x128xf32>
    %cst_29 = arith.constant dense<0.000000e+00> : vector<16xf32>
    %59 = vector.multi_reduction <add>, %58, %cst_29 [1] : vector<16x128xf32> to vector<16xf32>
    %60 = vector.shape_cast %59 : vector<16xf32> to vector<16x1xf32>
    %61 = arith.addf %55, %60 : vector<16x1xf32>
    %c0_30 = arith.constant 0 : index
    %c0_31 = arith.constant 0 : index
    %62 = vector.load %arg10[%c0_30, %c0_31] : memref<16x1xf32, #tpu.memory_space<vmem>>, vector<16x1xf32>
    tpu.vector_store %arg10[%c0_30, %c0_31], %61 {strides = array<i32>} : memref<16x1xf32, #tpu.memory_space<vmem>>, vector<16x1xf32>,
    %c0_32 = arith.constant 0 : index
    %c0_33 = arith.constant 0 : index
    %63 = vector.load %arg7[%c0_32, %c0_33] : memref<16x1xf32, #tpu.memory_space<vmem>>, vector<16x1xf32>
    tpu.vector_store %arg7[%c0_32, %c0_33], %36 {strides = array<i32>} : memref<16x1xf32, #tpu.memory_space<vmem>>, vector<16x1xf32>,
    %c0_i32_34 = arith.constant 0 : i32
    %64 = arith.cmpi eq, %arg1, %c0_i32_34 : i32
    %65 = arith.extui %64 : i1 to i32
    %c0_i32_35 = arith.constant 0 : i32
    %66 = arith.cmpi ne, %65, %c0_i32_35 : i32
    scf.if %66 {
      %c0_36 = arith.constant 0 : index
      %c0_37 = arith.constant 0 : index
      %67 = vector.load %arg7[%c0_36, %c0_37] : memref<16x1xf32, #tpu.memory_space<vmem>>, vector<16x1xf32>
      %c0_38 = arith.constant 0 : index
      %c0_39 = arith.constant 0 : index
      %68 = vector.load %arg8[%c0_38, %c0_39] : memref<16x1xf32, #tpu.memory_space<vmem>>, vector<16x1xf32>
      %69 = math.log %68 : vector<16x1xf32>
      %70 = arith.addf %67, %69 : vector<16x1xf32>
      %c0_40 = arith.constant 0 : index
      %c0_41 = arith.constant 0 : index
      %71 = vector.load %arg10[%c0_40, %c0_41] : memref<16x1xf32, #tpu.memory_space<vmem>>, vector<16x1xf32>
      %c0_42 = arith.constant 0 : index
      %c0_43 = arith.constant 0 : index
      %72 = vector.load %arg9[%c0_42, %c0_43] : memref<16x1xf32, #tpu.memory_space<vmem>>, vector<16x1xf32>
      %73 = arith.mulf %70, %71 : vector<16x1xf32>
      %74 = arith.subf %72, %73 : vector<16x1xf32>
      %75 = arith.divf %74, %71 : vector<16x1xf32>
      %cst_44 = arith.constant -1.000000e+00 : f32
      %76 = vector.broadcast %cst_44 : f32 to vector<16x1xf32>
      %77 = arith.mulf %76, %75 : vector<16x1xf32>
      %c0_45 = arith.constant 0 : index
      %c0_46 = arith.constant 0 : index
      %78 = vector.load %arg6[%c0_45, %c0_46] : memref<16x1xf32, #tpu.memory_space<vmem>>, vector<16x1xf32>
      tpu.vector_store %arg6[%c0_45, %c0_46], %77 {strides = array<i32>} : memref<16x1xf32, #tpu.memory_space<vmem>>, vector<16x1xf32>,
    } else {
    }
    return
  }
  func.func @transform_0(%arg0: i32, %arg1: i32) -> (i32, i32) {
    %c0_i32 = arith.constant 0 : i32
    %c0_i32_0 = arith.constant 0 : i32
    return %arg0, %c0_i32 : i32, i32
  }
  func.func @transform_1(%arg0: i32, %arg1: i32) -> (i32, i32) {
    %c0_i32 = arith.constant 0 : i32
    %c0_i32_0 = arith.constant 0 : i32
    return %arg1, %c0_i32 : i32, i32
  }
  func.func @transform_2(%arg0: i32, %arg1: i32) -> (i32, i32) {
    %c0_i32 = arith.constant 0 : i32
    %c0_i32_0 = arith.constant 0 : i32
    return %arg0, %c0_i32 : i32, i32
  }
  func.func @transform_3(%arg0: i32, %arg1: i32) -> (i32, i32) {
    %c0_i32 = arith.constant 0 : i32
    %c0_i32_0 = arith.constant 0 : i32
    return %c0_i32, %arg1 : i32, i32
  }
  func.func @transform_4(%arg0: i32, %arg1: i32) -> (i32, i32) {
    %c0_i32 = arith.constant 0 : i32
    %c0_i32_0 = arith.constant 0 : i32
    return %arg0, %c0_i32 : i32, i32
  }
}

</mosaic_0001>

<bundles_post_ra>
// kernel: tpu_custom_call.1
= control target key start
LH: loop header
LB: loop body
LE: loop exit
PB: predicated region body
PF: predicated region fallthrough
CT: control target
= control target key end

     0   :  { %vm50_vm0 = vcmask 261120   ;;  %v461_v29 = vmov 0   ;;  %vm21_vm2 = vcmask 7168   ;;  %v462_v30 = vmov -inf   ;;  %s640_s1 = inlined_call_operand.vmem [shape: f32[128,32], index: 1, kind: input, shape index: {}]   ;;  %s641_s0 = inlined_call_operand.vmem [shape: f32[16,32], index: 0, kind: input, shape index: {}]   ;;  %s642_s2 = inlined_call_operand.vmem [shape: s32[16,1], index: 2, kind: input, shape index: {}]   ;;  %s643_s3 = inlined_call_operand.vmem [shape: s32[1,128], index: 3, kind: input, shape index: {}]   ;;  %s644_s4 = inlined_call_operand.vmem [shape: f32[16,1], index: 4, kind: output, shape index: {}]  }
   0x1   :  { %v34_v0 = vld [vmem:[%s640_s1] sm:$0xff]  ;;  %v35_v1 = vld [vmem:[%s640_s1 + $0x8] sm:$0xff]  ;;  %vm497_vm1 = vmpackc.low %vm50_vm0, %vm50_vm0  ;;  %444 = vset.pattern.permute.xlu0 %v461_v29  ;;  %443 = vset.pattern.permute.xlu1 %v461_v29  ;;  %22 = vst.msk [vmem:[#allocation2] sm:$0xff] %vm21_vm2, %v462_v30  ;;  %v181_v31 = vlaneseq  ;;  %v463_v42 = vmov 0.0  }
   0x2   :  { %v392_v3 = vpack.c.bf16 %v35_v1, %v34_v0  ;;  %v36_v4 = vld [vmem:[%s640_s1 + $0x10] sm:$0xff]  ;;  %v37_v5 = vld [vmem:[%s640_s1 + $0x18] sm:$0xff]  ;;  %v30_v7 = vld [vmem:[%s641_s0] sm:$0xff]  ;;  %23 = vst.msk [vmem:[#allocation2 + $0x8] sm:$0xff] %vm21_vm2, %v462_v30 }
   0x3   :  { %v398_v6 = vpack.c.bf16 %v37_v5, %v36_v4  ;;  %v38_v8 = vld [vmem:[%s640_s1 + $0x20] sm:$0xff]  ;;  %v39_v9 = vld [vmem:[%s640_s1 + $0x28] sm:$0xff]  ;;  %v32_v10 = vmul.f32 14.285714, %v30_v7  ;;  %v40_v12 = vld [vmem:[%s640_s1 + $0x30] sm:$0xff]  ;;  %v182_v32 = vshrl.u32 %v181_v31, 7 }
   0x4   :  { %394 = vmatprep.subr.msk.bf16.mxu0 %vm497_vm1, %v392_v3  ;;  %v404_v11 = vpack.c.bf16 %v39_v9, %v38_v8  ;;  %v41_v13 = vld [vmem:[%s640_s1 + $0x38] sm:$0xff]  ;;  %v42_v15 = vld [vmem:[%s640_s1 + $0x40] sm:$0xff]  ;;  %v43_v16 = vld [vmem:[%s640_s1 + $0x48] sm:$0xff]  ;;  %v189_v33 = vand.u32 127, %v181_v31  ;;  %24 = vst.msk [vmem:[#allocation3] sm:$0xff] %vm21_vm2, %v463_v42 }
   0x5   :  { %397 = vmatpush3.bf16.xpose.msk.msra.mxu0 %vm497_vm1, %v392_v3  ;;  %389 = vmatprep.mubr.msk.f32.mxu0 %vm50_vm0, %v32_v10  ;;  %v410_v14 = vpack.c.bf16 %v41_v13, %v40_v12  ;;  %v416_v17 = vpack.c.bf16 %v43_v16, %v42_v15  ;;  %v44_v18 = vld [vmem:[%s640_s1 + $0x50] sm:$0xff]  ;;  %v45_v19 = vld [vmem:[%s640_s1 + $0x58] sm:$0xff]  ;;  %v46_v21 = vld [vmem:[%s640_s1 + $0x60] sm:$0xff]  ;;  %v183_v34 = vadd.s32 8, %v182_v32  ;;  %25 = vst.msk [vmem:[#allocation3 + $0x8] sm:$0xff] %vm21_vm2, %v463_v42 }
   0x6   :  { %400 = vmatprep.subr.msk.bf16.mxu0 %vm497_vm1, %v398_v6  ;;  %v422_v20 = vpack.c.bf16 %v45_v19, %v44_v18  ;;  %v47_v22 = vld [vmem:[%s640_s1 + $0x68] sm:$0xff]  ;;  %v48_v24 = vld [vmem:[%s640_s1 + $0x70] sm:$0xff]  ;;  %v49_v25 = vld [vmem:[%s640_s1 + $0x78] sm:$0xff]  ;;  %vm192_vm3 = vcmp.lt.s32.totalorder %v189_v33, 16  ;;  %vm193_vm4 = vcmp.ne.s32.totalorder %v189_v33, %v182_v32  ;;  %26 = vst.msk [vmem:[#allocation4] sm:$0xff] %vm21_vm2, %v463_v42 }
   0x7   :  { %v428_v23 = vpack.c.bf16 %v47_v22, %v46_v21  ;;  %v434_v26 = vpack.c.bf16 %v49_v25, %v48_v24  ;;  %v31_v27 = vld [vmem:[%s641_s0 + $0x8] sm:$0xff]  ;;  %vm585_vm5 = vmand %vm193_vm4, %vm192_vm3  ;;  %vm194_vm6 = vcmp.ne.s32.totalorder %v189_v33, %v183_v34  ;;  %v195_v41 = vld [vmem:[%s642_s2] sm:$0xff]  ;;  %27 = vst.msk [vmem:[#allocation4 + $0x8] sm:$0xff] %vm21_vm2, %v463_v42 }
   0x8   :  { %v33_v28 = vmul.f32 14.285714, %v31_v27  ;;  %vm591_vm7 = vmand %vm194_vm6, %vm192_vm3  ;;  %28 = vst.msk [vmem:[#allocation5] sm:$0xff] %vm21_vm2, %v463_v42  ;;  %v218_v43 = vld [vmem:[#allocation2] sm:$0xff]  ;;  %v196_v51 = vld [vmem:[%s642_s2 + $0x8] sm:$0xff] }
   0x9   :  { %29 = vst.msk [vmem:[#allocation5 + $0x8] sm:$0xff] %vm21_vm2, %v463_v42  ;;  %v219_v46 = vld [vmem:[#allocation2 + $0x8] sm:$0xff]  ;;  %v338_v52 = vld [vmem:[%s643_s3] ss:$0 sm:$0xff] }
   0xb   :  { %v242_v10 = vld [vmem:[#allocation3] sm:$0xff] }
   0xd   :  { %403 = vmatpush3.bf16.xpose.msk.msra.mxu0 %vm497_vm1, %v398_v6 }
   0xe   :  { %406 = vmatprep.subr.msk.bf16.mxu0 %vm497_vm1, %v404_v11 }
   0xf   :  { %v273_v4 = vld [vmem:[#allocation5] sm:$0xff] }
  0x10   :  { %v274_v19 = vld [vmem:[#allocation5 + $0x8] sm:$0xff] }
  0x15   :  { %409 = vmatpush3.bf16.xpose.msk.msra.mxu0 %vm497_vm1, %v404_v11 }
  0x16   :  { %412 = vmatprep.subr.msk.bf16.mxu0 %vm497_vm1, %v410_v14 }
  0x1d   :  { %415 = vmatpush3.bf16.xpose.msk.msra.mxu0 %vm497_vm1, %v410_v14  ;;  %v243_v14 = vld [vmem:[#allocation3 + $0x8] sm:$0xff] }
  0x1e   :  { %418 = vmatprep.subr.msk.bf16.mxu0 %vm497_vm1, %v416_v17 }
  0x25   :  { %421 = vmatpush3.bf16.xpose.msk.msra.mxu0 %vm497_vm1, %v416_v17 }
  0x26   :  { %424 = vmatprep.subr.msk.bf16.mxu0 %vm497_vm1, %v422_v20 }
  0x2d   :  { %427 = vmatpush3.bf16.xpose.msk.msra.mxu0 %vm497_vm1, %v422_v20 }
  0x2e   :  { %430 = vmatprep.subr.msk.bf16.mxu0 %vm497_vm1, %v428_v23 }
  0x35   :  { %433 = vmatpush3.bf16.xpose.msk.msra.mxu0 %vm497_vm1, %v428_v23  ;;  %v261_v23 = vld [vmem:[#allocation4] sm:$0xff] }
  0x36   :  { %436 = vmatprep.subr.msk.bf16.mxu0 %vm497_vm1, %v434_v26 }
  0x3d   :  { %439 = vmatpush3.bf16.xpose.msk.msra.mxu0 %vm497_vm1, %v434_v26 }
  0x44   :  { %390 = vmatmul.mubr.msk.f32.vlgmr.msra.gmra.mrb[0].mxu0 %vm50_vm0, %v33_v28  ;;  %v262_v28 = vld [vmem:[#allocation4 + $0x8] sm:$0xff] }
 0x117   :  { %v391_v36 = vpop.f32.mrb[0].mxu0 }
 0x118   :  { %v171_v37 = vpop.f32.mrb[1].mxu0  ;;  %v217_v40 = vsel %vm591_vm7, %v391_v36, -inf }
 0x119   :  { %v216_v38 = vsel %vm585_vm5, %v171_v37, -inf }
 0x11a   :  { %220 = vmax.xlane.f32.xlu0 %v216_v38 }
 0x11e   :  { %222 = vmax.xlane.f32.xlu0 %v217_v40 }
 0x134   :  { %199 = vperm.xlu0 %444, %v195_v41  }
 0x1a7   :  { %v221_v44 = vpop.xlane.xlu0 %220 }
 0x1a8   :  { %v224_v45 = vmax.f32 %v218_v43, %v221_v44 }
 0x1aa   :  { %v244_v47 = vsub.f32 %v218_v43, %v224_v45  ;;  %285 = vst.msk [vmem:[#allocation2] sm:$0xff] %vm21_vm2, %v224_v45  ;;  %228 = vperm.xlu1 %443, %v224_v45  }
 0x1ab   :  { %v223_v48 = vpop.xlane.xlu0 %222 }
 0x1ac   :  { %v225_v49 = vmax.f32 %v219_v46, %v223_v48  ;;  %v246_v7 = vmul.f32 1.442695, %v244_v47 }
 0x1ae   :  { %v245_v50 = vsub.f32 %v219_v46, %v225_v49  ;;  %286 = vst.msk [vmem:[#allocation2 + $0x8] sm:$0xff] %vm21_vm2, %v225_v49  ;;  %233 = vperm.xlu1 %443, %v225_v49  }
 0x1b0   :  { %v248_v8 = vmul.f32 1.442695, %v245_v50 }
 0x1b1   :  { %v290_v34 = vld [vmem:[#allocation2] sm:$0xff] }
 0x1b2   :  { %202 = vperm.xlu1 %443, %v196_v51  }
 0x1b3   :  { %v200_v53 = vpop.permute.xlu0 %199 }
 0x1b4   :  { %vm208_vm8 = vcmp.eq.s32.totalorder %v200_v53, %v338_v52 }
 0x1b5   :  { %vm616_vm9 = vmand %vm208_vm8, %vm585_vm5 }
 0x1b6   :  { %v263_v55 = vsel %vm616_vm9, %v171_v37, 0.0  ;;  %v275_v56 = vsel %vm616_vm9, 1.0, %v463_v42 }
 0x1b7   :  { %277 = vadd.xlane.f32.xlu0 %v275_v56 }
 0x229   :  { %v229_v57 = vpop.permute.xlu1 %228 }
 0x22a   :  { %v236_v58 = vsub.f32 %v216_v38, %v229_v57 }
 0x22c   :  { %v238_v59 = vmul.f32 1.442695, %v236_v58 }
 0x22d   :  { %v234_v60 = vpop.permute.xlu1 %233 }
 0x22e   :  { %445 = vpow2.f32 %v238_v59  ;;  %v237_v61 = vsub.f32 %v217_v40, %v234_v60  ;;  %v291_v40 = vld [vmem:[#allocation2 + $0x8] sm:$0xff] }
 0x230   :  { %v240_v62 = vmul.f32 1.442695, %v237_v61 }
 0x231   :  { %v203_v63 = vpop.permute.xlu1 %202 }
 0x232   :  { %447 = vpow2.f32 %v240_v62  ;;  %vm209_vm10 = vcmp.eq.s32.totalorder %v203_v63, %v338_v52 }
 0x233   :  { %vm215_vm11 = vmand %vm209_vm10, %vm591_vm7  ;;  %449 = vpow2.f32 %v246_v7 }
 0x234   :  { %v276_v2 = vsel %vm215_vm11, 1.0, %v463_v42  ;;  %v264_v3 = vsel %vm215_vm11, %v391_v36, 0.0  ;;  %451 = vpow2.f32 %v248_v8 }
 0x238   :  { %v446_v0 = vpop.eup %445 }
 0x239   :  { %252 = vadd.xlane.f32.xlu1 %v446_v0 }
 0x23c   :  { %v448_v1 = vpop.eup %447 }
 0x23d   :  { %254 = vadd.xlane.f32.xlu1 %v448_v1  ;;  %v450_v9 = vpop.eup %449 }
 0x23e   :  { %v250_v11 = vmul.f32 %v450_v9, %v242_v10  ;;  %v452_v12 = vpop.eup %451 }
 0x23f   :  { %v251_v16 = vmul.f32 %v452_v12, %v243_v14 }
 0x241   :  { %279 = vadd.xlane.f32.xlu1 %v276_v2 }
 0x244   :  { %v278_v5 = vpop.xlane.xlu0 %277 }
 0x245   :  { %265 = vadd.xlane.f32.xlu1 %v263_v55  ;;  %v281_v6 = vadd.f32 %v278_v5, %v273_v4 }
 0x247   :  { %283 = vst.msk [vmem:[#allocation5] sm:$0xff] %vm21_vm2, %v281_v6 }
 0x249   :  { %267 = vadd.xlane.f32.xlu1 %v264_v3 }
 0x24e   :  { %v300_v27 = vld [vmem:[#allocation5] sm:$0xff] }
 0x2c6   :  { %v253_v13 = vpop.xlane.xlu1 %252 }
 0x2c7   :  { %v256_v15 = vadd.f32 %v253_v13, %v250_v11 }
 0x2c9   :  { %259 = vst.msk [vmem:[#allocation3] sm:$0xff] %vm21_vm2, %v256_v15 }
 0x2ca   :  { %v255_v17 = vpop.xlane.xlu1 %254 }
 0x2cb   :  { %v257_v18 = vadd.f32 %v255_v17, %v251_v16 }
 0x2cd   :  { %260 = vst.msk [vmem:[#allocation3 + $0x8] sm:$0xff] %vm21_vm2, %v257_v18 }
 0x2ce   :  { %v280_v20 = vpop.xlane.xlu1 %279 }
 0x2cf   :  { %v282_v21 = vadd.f32 %v280_v20, %v274_v19 }
 0x2d0   :  { %v292_v22 = vld [vmem:[#allocation3] sm:$0xff] }
 0x2d1   :  { %453 = vlog2.f32 %v292_v22  ;;  %284 = vst.msk [vmem:[#allocation5 + $0x8] sm:$0xff] %vm21_vm2, %v282_v21 }
 0x2d2   :  { %v266_v24 = vpop.xlane.xlu1 %265 }
 0x2d3   :  { %v269_v25 = vadd.f32 %v266_v24, %v261_v23 }
 0x2d4   :  { %v293_v26 = vld [vmem:[#allocation3 + $0x8] sm:$0xff] }
 0x2d5   :  { %455 = vlog2.f32 %v293_v26  ;;  %271 = vst.msk [vmem:[#allocation4] sm:$0xff] %vm21_vm2, %v269_v25 }
 0x2d6   :  { %v268_v29 = vpop.xlane.xlu1 %267  ;;  %457 = vrcp.f32 %v300_v27 }
 0x2d7   :  { %v270_v30 = vadd.f32 %v268_v29, %v262_v28 }
 0x2d8   :  { %v301_v31 = vld [vmem:[#allocation5 + $0x8] sm:$0xff] }
 0x2d9   :  { %272 = vst.msk [vmem:[#allocation4 + $0x8] sm:$0xff] %vm21_vm2, %v270_v30  ;;  %459 = vrcp.f32 %v301_v31 }
 0x2db   :  { %v454_v32 = vpop.eup %453 }
 0x2dc   :  { %v295_v33 = vmul.f32 0.6931472, %v454_v32  ;;  %v302_v41 = vld [vmem:[#allocation4] sm:$0xff] }
 0x2de   :  { %v298_v35 = vadd.f32 %v295_v33, %v290_v34 }
 0x2df   :  { %v456_v36 = vpop.eup %455 }
 0x2e0   :  { %v297_v37 = vmul.f32 0.6931472, %v456_v36  ;;  %v304_v38 = vmul.f32 %v300_v27, %v298_v35  ;;  %v458_v39 = vpop.eup %457  ;;  %v303_v46 = vld [vmem:[#allocation4 + $0x8] sm:$0xff] }
 0x2e2   :  { %v299_v42 = vadd.f32 %v297_v37, %v291_v40  ;;  %v306_v43 = vsub.f32 %v302_v41, %v304_v38 }
 0x2e3   :  { %v460_v49 = vpop.eup %459 }
 0x2e4   :  { %v305_v44 = vmul.f32 %v301_v31, %v299_v42  ;;  %v309_v45 = vmul.f32 %v458_v39, %v306_v43 }
 0x2e6   :  { %v312_v47 = vmul.f32 -1.0, %v309_v45  ;;  %v307_v48 = vsub.f32 %v303_v46, %v305_v44 }
 0x2e8   :  { %314 = vst.msk [vmem:[%s644_s4] sm:$0xff] %vm21_vm2, %v312_v47  ;;  %v311_v50 = vmul.f32 %v460_v49, %v307_v48 }
 0x2ea   :  { %v313_v51 = vmul.f32 -1.0, %v311_v50 }
 0x2ec   :  { %315 = vst.msk [vmem:[%s644_s4 + $0x8] sm:$0xff] %vm21_vm2, %v313_v51 }

</bundles_post_ra>
